<compile_context>
chip_gen: v7x
topology: tpu7x:2x2x1
jax: 0.10.0
libtpu: 0.0.40
codegen_flags: <defaults>
</compile_context>

<pallas_src>
import math

import numpy as np

import jax
import jax.numpy as jnp
from jax.experimental import pallas as pl
from jax.experimental.pallas import tpu as pltpu

EPS = 1e-5  # nn.LayerNorm default


# ----------------------------------------------------------------------------- kernel
def _decoder_kernel(x_ref, w_ref, b_ref, code_ref, o_ref):
    """LayerNorm(D) -> xhat @ W' + b' -> fused alpha tanh + circle blend.

    code (int32, VMEM-resident): 0 = pass-through (RGB), 1 = tanh (alpha outside
    circle), 2 = force 1.0 (alpha inside circle). LN gamma/beta, proj bias and
    init_bias are pre-folded into W'/b'. All VPU/EUP math in f32; only the MXU
    input is cast to the weight dtype (bf16 by default).
    """
    x = x_ref[...].astype(jnp.float32)                          # (tm, D)
    mu = jnp.mean(x, axis=-1, keepdims=True)
    xc = x - mu
    var = jnp.mean(xc * xc, axis=-1, keepdims=True)
    xn = xc * jax.lax.rsqrt(var + EPS)

    y = jnp.dot(xn.astype(w_ref.dtype), w_ref[...],
                preferred_element_type=jnp.float32) + b_ref[...]   # (tm, P)

    code = code_ref[...]                                        # (tm, P) int32, resident
    t = jnp.tanh(y)                                             # EUP slot; hidden under HBM
    alpha = jnp.where(code == 2, 1.0, t)                        # inside circle -> 1.0
    o_ref[...] = jnp.where(code == 0, y, alpha).astype(o_ref.dtype)  # one lane-dense store


# ----------------------------------------------------------------------------- tiling
def _choose_tm(M, N):
    """Row tile: multiple of lcm(N, 8) (code periodicity + sublane), <= 2048,
    and <= M//2 when possible so the grid has >= 2 steps (v7x megacore)."""
    base = (N * 8) // math.gcd(N, 8)
    if M <= base:
        return base
    tm = base
    while tm * 2 <= min(2048, M // 2):
        tm *= 2
    return tm


def decode_tokens(x2d, w, b, code_slab, out_dtype=jnp.float32):
    """Fused LN + projection + alpha/circle blend on the (M, D) token matrix."""
    M, D = x2d.shape
    P = w.shape[1]
    tm = code_slab.shape[0]

    n_blocks = pl.cdiv(M, tm)
    Mp = n_blocks * tm
    if Mp != M:
        # Zero-pad tail rows (LN of a zero row is finite; padded rows are sliced off).
        x2d = jnp.pad(x2d, ((0, Mp - M), (0, 0)))

    cost = pl.CostEstimate(
        flops=2 * Mp * D * P,
        transcendentals=Mp * P,
        bytes_accessed=(Mp * D * x2d.dtype.itemsize            # token stream in
                        + D * P * w.dtype.itemsize             # folded weights (resident)
                        + P * 4                                 # folded bias (resident)
                        + tm * P * 4                            # code slab (read once)
                        + Mp * P * jnp.dtype(out_dtype).itemsize),  # image out
    )

    out = pl.pallas_call(
        _decoder_kernel,
        out_shape=jax.ShapeDtypeStruct((Mp, P), out_dtype),
        grid=(n_blocks,),
        in_specs=[
            pl.BlockSpec((tm, D), lambda i: (i, 0)),    # tokens, tiled over M
            pl.BlockSpec((D, P), lambda i: (0, 0)),     # folded weights (resident)
            pl.BlockSpec((1, P), lambda i: (0, 0)),     # folded bias (resident)
            pl.BlockSpec((tm, P), lambda i: (0, 0)),    # code slab (resident, DMA once)
        ],
        out_specs=pl.BlockSpec((tm, P), lambda i: (i, 0)),  # lane-dense (P=256)
        compiler_params=pltpu.CompilerParams(dimension_semantics=("parallel",)),
        cost_estimate=cost,
    )(x2d, w, b, code_slab)
    return out[:M] if Mp != M else out


# ----------------------------------------------------------------------------- glue
def get_circle_np(shape, p=1.0):
    """Port of the PyTorch get_circle: (H, W) binary mask."""
    H, W = shape
    x = np.abs(np.arange(W, dtype=np.float32)[None, :] - W / 2.0)
    y = np.abs(np.arange(H, dtype=np.float32)[:, None] - H / 2.0)
    r = np.sqrt(x * x + y * y)
    return (r < p * min(H, W) / 2.0).astype(np.int32)


def build_alpha_code(latent_shape, patch, num_channels, has_alpha, use_prior, p=0.75):
    """Per-token, per-output-lane int code (N, P): 0 pass, 1 tanh, 2 force-one."""
    Hl, Wl = latent_shape
    N = Hl * Wl
    code = np.zeros((N, patch * patch, num_channels), np.int32)
    if has_alpha:
        if use_prior:
            H, W = Hl * patch, Wl * patch
            circ = get_circle_np((H, W), p=p)                      # (H, W) in {0,1}
            circ = circ.reshape(Hl, patch, Wl, patch)
            circ = circ.transpose(0, 2, 1, 3).reshape(N, patch * patch)
            code[:, :, num_channels - 1] = 1 + circ                # outside=1, inside=2
        else:
            code[:, :, num_channels - 1] = 1
    return code.reshape(N, patch * patch * num_channels)


def unpatchify(tokens_5d, latent_shape, patch):
    """(B, N, p*p, C) -> NCHW image (B, C, Hl*p, Wl*p). Trace-time layout glue only."""
    Hl, Wl = latent_shape
    B, _, _, C = tokens_5d.shape
    y = tokens_5d.reshape(B, Hl, Wl, patch, patch, C)
    y = jnp.transpose(y, (0, 5, 1, 3, 2, 4))                       # (B, C, Hl, p, Wl, p)
    return y.reshape(B, C, Hl * patch, Wl * patch)


class ImageDecoderPallas:
    """JAX/Pallas equivalent of ImageDecoder (dtype='RGBA', use_prior=True)."""

    def __init__(self, key, embed_dim=32, patch_size=8, obj_shape=(2, 2),
                 latent_shape=(4, 4), scale_factor=1, init_mode='',
                 mxu_dtype=jnp.bfloat16, out_dtype=jnp.float32):
        self.embed_dim = embed_dim
        self.patch_size = patch_size
        self.num_channels = 4                                   # 'RGBA' -> 3 + 1 alpha
        self.has_alpha = True
        self.use_prior = True
        self.scale_factor = scale_factor
        self.out_dtype = out_dtype
        lat_obj = obj_shape[0] * obj_shape[1]
        lat = latent_shape[0] * latent_shape[1]
        self.latent_shape = {lat: latent_shape, lat_obj: obj_shape}

        # Per-supported-latent-shape circle/alpha code tables (fixes the original
        # obj-shape-only circle buffer mismatch for the latent-shape input path).
        self.alpha_code = {
            n: build_alpha_code(ls, patch_size, self.num_channels,
                                self.has_alpha, self.use_prior, p=0.75)
            for n, ls in self.latent_shape.items()
        }
        self._slab_cache = {}   # (N, tm) -> device-resident (tm, P) int32 slab

        P = patch_size * patch_size * self.num_channels
        k_w, _ = jax.random.split(key)
        # Deterministic synthetic params (trunc-normal-ish proj, LN gamma/beta = 1/0).
        gamma = jnp.ones((embed_dim,), jnp.float32)
        beta = jnp.zeros((embed_dim,), jnp.float32)
        proj_w = 0.02 * jax.random.normal(k_w, (embed_dim, P), jnp.float32)
        proj_b = jnp.zeros((P,), jnp.float32)
        if init_mode in ('zero', 'five'):
            proj_w = jnp.zeros_like(proj_w)
        init_bias = 5.0 if init_mode == 'five' else 0.0

        # Fold LN affine + biases into the projection:  y = xhat @ W' + b'.
        self.w_folded = (gamma[:, None] * proj_w).astype(mxu_dtype)
        self.b_folded = (beta @ proj_w + proj_b + init_bias).reshape(1, P).astype(jnp.float32)

    def _code_slab(self, N, tm):
        key = (N, tm)
        if key not in self._slab_cache:
            self._slab_cache[key] = jnp.asarray(
                np.tile(self.alpha_code[N], (tm // N, 1)), dtype=jnp.int32)
        return self._slab_cache[key]

    def __call__(self, x, drop_alpha=False):
        # x: (B, N, D) -- already 3-D, so flatten(x, ndim=3) is identity.
        B, N, D = x.shape
        latent_shape = self.latent_shape[N]
        patch, C = self.patch_size, self.num_channels

        M = B * N
        tm = _choose_tm(M, N)
        code_slab = self._code_slab(N, tm)

        # Fused hot path: LN + proj + alpha/circle blend (single pallas_call).
        tokens = decode_tokens(x.reshape(M, D), self.w_folded, self.b_folded,
                               code_slab, out_dtype=self.out_dtype)

        tok = tokens.reshape(B, N, patch * patch, C)
        if self.has_alpha and drop_alpha:
            tok = tok[..., : C - 1]      # drop alpha BEFORE the NCHW transpose (less HBM)
        img = unpatchify(tok, latent_shape, patch)

        if self.scale_factor != 1:
            # TODO(synk): bilinear F.interpolate path (scale_factor != 1) not implemented.
            raise NotImplementedError
        return img


# ----------------------------------------------------------------------------- reference
def _reference_forward(x, decoder):
    """Pure-JAX reference of the same forward pass (for a sanity check)."""
    B, N, D = x.shape
    mu = jnp.mean(x, axis=-1, keepdims=True)
    xc = x - mu
    var = jnp.mean(xc * xc, axis=-1, keepdims=True)
    xn = xc * jax.lax.rsqrt(var + EPS)
    y = xn.reshape(B * N, D) @ decoder.w_folded.astype(jnp.float32) + decoder.b_folded
    tok = y.reshape(B, N, decoder.patch_size ** 2, decoder.num_channels)
    img = unpatchify(tok, decoder.latent_shape[N], decoder.patch_size)
    circ = jnp.asarray(get_circle_np((img.shape[2], img.shape[3]), p=0.75),
                       jnp.float32)[None, None]
    alpha = jnp.tanh(img[:, -1:])
    alpha = circ * 1.0 + (1.0 - circ) * alpha
    return jnp.concatenate([img[:, :-1], alpha], axis=1)


# ----------------------------------------------------------------------------- main
if __name__ == "__main__":
    key = jax.random.PRNGKey(0)
    k_param, k_x1, k_x2 = jax.random.split(key, 3)

    B = 2
    embed_dim = 32
    patch_size = 8
    obj_shape = (2, 2)          # N = 4 tokens  -> 4 x 16 x 16 image
    latent_shape = (4, 4)       # N = 16 tokens -> 4 x 32 x 32 image

    decoder = ImageDecoderPallas(k_param, embed_dim=embed_dim, patch_size=patch_size,
                                 obj_shape=obj_shape, latent_shape=latent_shape,
                                 scale_factor=1, init_mode='')

    # Obj-token path (N = 4).
    x1 = jax.random.normal(k_x1, (B, obj_shape[0] * obj_shape[1], embed_dim), jnp.float32)
    out1 = jax.block_until_ready(decoder(x1))
    assert out1.shape == (B, 4, 16, 16), out1.shape
    ref1 = jax.block_until_ready(_reference_forward(x1, decoder))
    assert jnp.allclose(out1, ref1, atol=1e-2, rtol=1e-2), float(jnp.max(jnp.abs(out1 - ref1)))

    # Latent-token path (N = 16) -- exercises grid > 1 (v7x megacore split).
    x2 = jax.random.normal(k_x2, (B, latent_shape[0] * latent_shape[1], embed_dim), jnp.float32)
    out2 = jax.block_until_ready(decoder(x2))
    assert out2.shape == (B, 4, 32, 32), out2.shape
    ref2 = jax.block_until_ready(_reference_forward(x2, decoder))
    assert jnp.allclose(out2, ref2, atol=1e-2, rtol=1e-2), float(jnp.max(jnp.abs(out2 - ref2)))

    # drop_alpha path (alpha sliced in token layout before the NCHW transpose).
    out3 = jax.block_until_ready(decoder(x1, drop_alpha=True))
    assert out3.shape == (B, 3, 16, 16), out3.shape
    assert jnp.allclose(out3, ref1[:, :3], atol=1e-2, rtol=1e-2)

    print("KERNEL_OK")
</pallas_src>

<mosaic_0001>
module attributes {stable_mosaic.version = 11 : i64} {
  func.func @_decoder_kernel(%arg0: i32, %arg1: memref<8x32xf32, #tpu.memory_space<vmem>>, %arg2: memref<32x256xbf16, #tpu.memory_space<vmem>>, %arg3: memref<1x256xf32, #tpu.memory_space<vmem>>, %arg4: memref<8x256xi32, #tpu.memory_space<vmem>>, %arg5: memref<8x256xf32, #tpu.memory_space<vmem>>) attributes {dimension_semantics = [#tpu.dimension_semantics<parallel>], iteration_bounds = array<i64: 1>, scalar_prefetch = 0 : i64, scratch_operands = 0 : i64, tpu.core_type = #tpu.core_type<tc>, window_params = [{transform_indices = @transform_0, window_bounds = array<i64: 8, 32>}, {pipeline_mode = #tpu.pipeline_mode<synchronous>, transform_indices = @transform_1, window_bounds = array<i64: 32, 256>}, {pipeline_mode = #tpu.pipeline_mode<synchronous>, transform_indices = @transform_2, window_bounds = array<i64: 1, 256>}, {pipeline_mode = #tpu.pipeline_mode<synchronous>, transform_indices = @transform_3, window_bounds = array<i64: 8, 256>}, {transform_indices = @transform_4, window_bounds = array<i64: 8, 256>}]} {
    %c0 = arith.constant 0 : index
    %c0_0 = arith.constant 0 : index
    %0 = vector.load %arg1[%c0, %c0_0] : memref<8x32xf32, #tpu.memory_space<vmem>>, vector<8x32xf32>
    %cst = arith.constant dense<0.000000e+00> : vector<8xf32>
    %1 = vector.multi_reduction <add>, %0, %cst [1] : vector<8x32xf32> to vector<8xf32>
    %2 = vector.shape_cast %1 : vector<8xf32> to vector<8x1xf32>
    %cst_1 = arith.constant 3.200000e+01 : f32
    %3 = vector.broadcast %cst_1 : f32 to vector<8x1xf32>
    %4 = arith.divf %2, %3 : vector<8x1xf32>
    %5 = vector.broadcast %4 : vector<8x1xf32> to vector<8x32xf32>
    %6 = arith.subf %0, %5 : vector<8x32xf32>
    %7 = arith.mulf %6, %6 : vector<8x32xf32>
    %cst_2 = arith.constant dense<0.000000e+00> : vector<8xf32>
    %8 = vector.multi_reduction <add>, %7, %cst_2 [1] : vector<8x32xf32> to vector<8xf32>
    %9 = vector.shape_cast %8 : vector<8xf32> to vector<8x1xf32>
    %cst_3 = arith.constant 3.200000e+01 : f32
    %10 = vector.broadcast %cst_3 : f32 to vector<8x1xf32>
    %11 = arith.divf %9, %10 : vector<8x1xf32>
    %cst_4 = arith.constant 9.99999974E-6 : f32
    %12 = vector.broadcast %cst_4 : f32 to vector<8x1xf32>
    %13 = arith.addf %11, %12 : vector<8x1xf32>
    %14 = math.rsqrt %13 : vector<8x1xf32>
    %15 = vector.broadcast %14 : vector<8x1xf32> to vector<8x32xf32>
    %16 = arith.mulf %6, %15 : vector<8x32xf32>
    %17 = arith.truncf %16 : vector<8x32xf32> to vector<8x32xbf16>
    %c0_5 = arith.constant 0 : index
    %c0_6 = arith.constant 0 : index
    %18 = vector.load %arg2[%c0_5, %c0_6] : memref<32x256xbf16, #tpu.memory_space<vmem>>, vector<32x256xbf16>
    %cst_7 = arith.constant dense<0.000000e+00> : vector<8x256xf32>
    %19 = tpu.matmul %17, %18, %cst_7 {dimension_numbers = #tpu.dot_dimension_numbers<[1], [0], [0], [1], [0, 0, 1, 1], [], []>} : vector<8x32xbf16>, vector<32x256xbf16>, vector<8x256xf32> -> vector<8x256xf32>
    %c0_8 = arith.constant 0 : index
    %c0_9 = arith.constant 0 : index
    %20 = vector.load %arg3[%c0_8, %c0_9] : memref<1x256xf32, #tpu.memory_space<vmem>>, vector<1x256xf32>
    %21 = vector.broadcast %20 : vector<1x256xf32> to vector<8x256xf32>
    %22 = arith.addf %19, %21 : vector<8x256xf32>
    %c0_10 = arith.constant 0 : index
    %c0_11 = arith.constant 0 : index
    %23 = vector.load %arg4[%c0_10, %c0_11] : memref<8x256xi32, #tpu.memory_space<vmem>>, vector<8x256xi32>
    %24 = math.tanh %22 : vector<8x256xf32>
    %c2_i32 = arith.constant 2 : i32
    %25 = vector.broadcast %c2_i32 : i32 to vector<8x256xi32>
    %26 = arith.cmpi eq, %23, %25 : vector<8x256xi32>
    %cst_12 = arith.constant 1.000000e+00 : f32
    %27 = vector.broadcast %cst_12 : f32 to vector<8x256xf32>
    %28 = arith.select %26, %27, %24 : vector<8x256xi1>, vector<8x256xf32>
    %c0_i32 = arith.constant 0 : i32
    %29 = vector.broadcast %c0_i32 : i32 to vector<8x256xi32>
    %30 = arith.cmpi eq, %23, %29 : vector<8x256xi32>
    %31 = arith.select %30, %22, %28 : vector<8x256xi1>, vector<8x256xf32>
    %c0_13 = arith.constant 0 : index
    %c0_14 = arith.constant 0 : index
    %32 = vector.load %arg5[%c0_13, %c0_14] : memref<8x256xf32, #tpu.memory_space<vmem>>, vector<8x256xf32>
    tpu.vector_store %arg5[%c0_13, %c0_14], %31 {strides = array<i32>} : memref<8x256xf32, #tpu.memory_space<vmem>>, vector<8x256xf32>,
    return
  }
  func.func @transform_0(%arg0: i32) -> (i32, i32) {
    %c0_i32 = arith.constant 0 : i32
    %c0_i32_0 = arith.constant 0 : i32
    return %arg0, %c0_i32 : i32, i32
  }
  func.func @transform_1(%arg0: i32) -> (i32, i32) {
    %c0_i32 = arith.constant 0 : i32
    %c0_i32_0 = arith.constant 0 : i32
    %c0_i32_1 = arith.constant 0 : i32
    return %c0_i32, %c0_i32_0 : i32, i32
  }
  func.func @transform_2(%arg0: i32) -> (i32, i32) {
    %c0_i32 = arith.constant 0 : i32
    %c0_i32_0 = arith.constant 0 : i32
    %c0_i32_1 = arith.constant 0 : i32
    return %c0_i32, %c0_i32_0 : i32, i32
  }
  func.func @transform_3(%arg0: i32) -> (i32, i32) {
    %c0_i32 = arith.constant 0 : i32
    %c0_i32_0 = arith.constant 0 : i32
    %c0_i32_1 = arith.constant 0 : i32
    return %c0_i32, %c0_i32_0 : i32, i32
  }
  func.func @transform_4(%arg0: i32) -> (i32, i32) {
    %c0_i32 = arith.constant 0 : i32
    %c0_i32_0 = arith.constant 0 : i32
    return %arg0, %c0_i32 : i32, i32
  }
}

</mosaic_0001>

<bundles_post_ra>
// kernel: tpu_custom_call.1
= control target key start
LH: loop header
LB: loop body
LE: loop exit
PB: predicated region body
PF: predicated region fallthrough
CT: control target
= control target key end

     0   :  { %9 = vsyncpa [#allocation3], 0  ;;  %s387_s0 = inlined_call_operand.hbm [shape: f32[8,32], index: 0, kind: input, shape index: {}]   ;;  %s388_s1 = inlined_call_operand.hbm [shape: bf16[32,256], index: 1, kind: input, shape index: {}]   ;;  %s389_s2 = inlined_call_operand.vmem [shape: f32[1,256], index: 2, kind: input, shape index: {}]   ;;  %s390_s3 = inlined_call_operand.hbm [shape: s32[8,256], index: 3, kind: input, shape index: {}]   ;;  %s391_s4 = inlined_call_operand.hbm [shape: f32[8,256], index: 4, kind: output, shape index: {}]  }
   0x1   :  { %10 = vsyncpa [#allocation6], 0 }
   0x2   :  { %11 = vsyncpa [#allocation4], 0  ;;  %s301_s15 = smov [#allocation5]   ;;  %s207_s19 = scalar_lea.hbm %s388_s1, 512 }
   0x3   :  { %s27_s16 = sshll.u32 %s301_s15, 4  ;;  %p208_p0 = scmp.ne.s32.totalorder %s388_s1, %s207_s19  ;;  %s28_s16 = int_to_ptr.vmem [resolvable:$true] %s27_s16 }
   0x4   :  { %p211_p1 = scmp.lt.u32.totalorder %s207_s19, %s388_s1 }
   0x6   :  { %p213_p2 = pnand %p211_p1, %p208_p0 }
   0x8   :  { %216 = shalt.err (!%p213_p2)
}
   0x9   :  { %s217_s24 = scalar_lea.vmem %s28_s16, 512  ;;  %p222_p4 = scmp.lt.s32.totalorder %s28_s16, %s28_s16 }
   0xa   :  { %p218_p3 = scmp.ne.s32.totalorder %s28_s16, %s217_s24  ;;  %p223_p5 = scmp.lt.s32.totalorder %s217_s24, %s217_s24 }
   0xc   :  { %p224_p6 = por %p223_p5, %p222_p4 }
   0xe   :  { %p225_p7 = pnand %p224_p6, %p218_p3 }
  0x10   :  { %228 = shalt.err (!%p225_p7)
}
  0x11   :  { %s302_s25 = smov 128   ;;  %s303_s26 = smov 8  }
  0x12   :  { %33 = dma.hbm_to_vmem [thread:$0]  %s388_s1, 512, %s28_s16, [#allocation6], %s302_s25, %s302_s25, %s303_s26  }
  0x13   :  { %s304_s29 = smov [#allocation2]   ;;  %s305_s5 = smov [#allocation7]  }
  0x14   :  { %s18_s30 = sshll.u32 %s304_s29, 4  ;;  %s42_s6 = sshll.u32 %s305_s5, 4  ;;  %s19_s30 = int_to_ptr.vmem [resolvable:$true] %s18_s30  ;;  %s43_s6 = int_to_ptr.vmem [resolvable:$true] %s42_s6 }
  0x15   :  { %s229_s9 = scalar_lea.hbm %s387_s0, 128 }
  0x16   :  { %p230_p8 = scmp.ne.s32.totalorder %s387_s0, %s229_s9  ;;  %p233_p9 = scmp.lt.u32.totalorder %s229_s9, %s387_s0 }
  0x18   :  { %p235_p10 = pnand %p233_p9, %p230_p8 }
  0x1a   :  { %238 = shalt.err (!%p235_p10)
}
  0x1b   :  { %s239_s1 = scalar_lea.vmem %s19_s30, 128  ;;  %p244_p12 = scmp.lt.s32.totalorder %s19_s30, %s19_s30 }
  0x1c   :  { %p240_p11 = scmp.ne.s32.totalorder %s19_s30, %s239_s1  ;;  %p245_p13 = scmp.lt.s32.totalorder %s239_s1, %s239_s1 }
  0x1e   :  { %p246_p0 = por %p245_p13, %p244_p12 }
  0x20   :  { %p247_p1 = pnand %p246_p0, %p240_p11 }
  0x22   :  { %250 = shalt.err (!%p247_p1)
}
  0x23   :  { %21 = dma.hbm_to_vmem [thread:$0]  %s387_s0, 128, %s19_s30, [#allocation3]  }
  0x24   :  { %s251_s18 = scalar_lea.hbm %s390_s3, 256 }
  0x25   :  { %p252_p2 = scmp.ne.s32.totalorder %s390_s3, %s251_s18  ;;  %p255_p3 = scmp.lt.u32.totalorder %s251_s18, %s390_s3 }
  0x27   :  { %p257_p4 = pnand %p255_p3, %p252_p2 }
  0x29   :  { %260 = shalt.err (!%p257_p4)
}
  0x2a   :  { %s261_s23 = scalar_lea.vmem %s43_s6, 256  ;;  %p266_p6 = scmp.lt.s32.totalorder %s43_s6, %s43_s6 }
  0x2b   :  { %p262_p5 = scmp.ne.s32.totalorder %s43_s6, %s261_s23  ;;  %p267_p7 = scmp.lt.s32.totalorder %s261_s23, %s261_s23 }
  0x2d   :  { %p268_p8 = por %p267_p7, %p266_p6 }
  0x2f   :  { %p269_p9 = pnand %p268_p8, %p262_p5 }
  0x31   :  { %272 = shalt.err (!%p269_p9)
}
  0x32   :  { %45 = dma.hbm_to_vmem [thread:$0]  %s390_s3, 256, %s43_s6, [#allocation6]  }
  0x33   :  { %295 = dma.done.wait [#allocation3], 128  }
  0x34   :  { %296 = vsyncadd [#allocation3], 4294967168 }
  0x35   :  { %297 = dma.done.wait [#allocation6], 768  }
  0x36   :  { %298 = vsyncadd [#allocation6], 4294966528  ;;  %vm57_vm0 = vcmask 261120   ;;  %v56_v0 = vld [vmem:[#allocation2] sm:$0xff]  ;;  %v195_v7 = vld [vmem:[#allocation5 + $0x4] ss:$8 sps:$4 sm:$0xff]   ;;  %v79_v18 = vlaneseq }
  0x37   :  { %v58_v1 = vsel %vm57_vm0, %v56_v0, 0.0  ;;  %v197_v8 = vld [vmem:[#allocation5] ss:$8 sps:$4 sm:$0xff]   ;;  %v198_v9 = vld [vmem:[#allocation5 + $0x14] ss:$8 sps:$4 sm:$0xff]   ;;  %112 = vmatprep.subr.bf16.mxu0 %v195_v7  ;;  %v306_v10 = vmov 0  }
  0x38   :  { %59 = vadd.xlane.f32.xlu0 %v58_v1  ;;  %144 = vmatprep.mubr.bf16.mxu0 %v306_v10  ;;  %v200_v11 = vld [vmem:[#allocation5 + $0x10] ss:$8 sps:$4 sm:$0xff]   ;;  %v80_v19 = vshrl.u32 %v79_v18, 7  ;;  %v153_v31 = vld [vmem:[#allocation7] sm:$0xff]  ;;  %v154_v32 = vld [vmem:[#allocation7 + $0x8] sm:$0xff]  ;;  %s307_s26 = smov [#allocation8]  }
  0x39   :  { %113 = vmatpush1.bf16.msra.mxu0 %v197_v8  ;;  %v77_v21 = vld [vmem:[%s389_s2] sm:$0x3]  ;;  %vm157_vm1 = vcmp.eq.s32.totalorder %v153_v31, 2  ;;  %vm158_vm2 = vcmp.eq.s32.totalorder %v154_v32, 2  ;;  %vm161_vm3 = vcmp.eq.s32.totalorder %v153_v31, 0  ;;  %s173_s27 = sshll.u32 %s307_s26, 4  ;;  %s174_s27 = int_to_ptr.vmem [resolvable:$true] %s173_s27 }
  0x3a   :  { %114 = vmatprep.subr.bf16.mxu0 %v198_v9  ;;  %v81_v20 = vsub.s32 0, %v80_v19  ;;  %v85_v22 = vsub.s32 1, %v80_v19  ;;  %vm162_vm4 = vcmp.eq.s32.totalorder %v154_v32, 0  ;;  %s273_s2 = scalar_lea.vmem %s174_s27, 256  ;;  %p278_p11 = scmp.lt.s32.totalorder %s174_s27, %s174_s27 }
  0x3b   :  { %p274_p10 = scmp.ne.s32.totalorder %s174_s27, %s273_s2  ;;  %p279_p12 = scmp.lt.s32.totalorder %s273_s2, %s273_s2 }
  0x3c   :  { %v82_v23 = vrot.slane %v77_v21, %v81_v20  ;;  %v86_v24 = vrot.slane %v77_v21, %v85_v22 }
  0x3d   :  { %115 = vmatpush1.bf16.msra.mxu0 %v200_v11  ;;  %p280_p13 = por %p279_p12, %p278_p11 }
  0x3f   :  { %p281_p0 = pnand %p280_p13, %p274_p10 }
  0xc5   :  { %v60_v2 = vpop.xlane.xlu0 %59 }
  0xc6   :  { %v62_v3 = vmul.f32 0.03125, %v60_v2 }
  0xc8   :  { %v63_v4 = vsub.f32 %v56_v0, %v62_v3 }
  0xca   :  { %v64_v5 = vmul.f32 %v63_v4, %v63_v4 }
  0xcc   :  { %v65_v6 = vsel %vm57_vm0, %v64_v5, 0.0 }
  0xcd   :  { %66 = vadd.xlane.f32.xlu0 %v65_v6 }
 0x15a   :  { %v67_v12 = vpop.xlane.xlu0 %66 }
 0x15b   :  { %v68_v13 = vmul.f32 0.03125, %v67_v12 }
 0x15d   :  { %v69_v14 = vadd.f32 1e-05, %v68_v13 }
 0x15f   :  { %201 = vrsqrt.f32 %v69_v14 }
 0x169   :  { %v202_v15 = vpop.eup %201 }
 0x16a   :  { %v71_v16 = vmul.f32 %v202_v15, %v63_v4 }
 0x16c   :  { %v72_v17 = vpack.c.bf16 %v71_v16, %v71_v16 }
 0x16e   :  { %187 = vmatmul.mubr.msk.bf16.vlgmr.msra.gmra.mrb[0].mxu0 %vm57_vm0, %v72_v17 }
 0x241   :  { %v146_v25 = vpop.f32.mrb[0].mxu0 }
 0x242   :  { %v147_v26 = vadd.f32 %v146_v25, %v82_v23  ;;  %v148_v27 = vpop.f32.mrb[1].mxu0 }
 0x243   :  { %v149_v28 = vadd.f32 %v148_v27, %v86_v24  ;;  %v150_v29 = vpop.f32.mrb[2].mxu0 }
 0x244   :  { %203 = vtanh.f32 %v147_v26  ;;  %v151_v30 = vpop.f32.mrb[3].mxu0 }
 0x245   :  { %205 = vtanh.f32 %v149_v28 }
 0x24e   :  { %v204_v33 = vpop.eup %203 }
 0x24f   :  { %v206_v34 = vpop.eup %205  ;;  %v159_v35 = vsel %vm157_vm1, 1.0, %v204_v33 }
 0x250   :  { %v160_v36 = vsel %vm158_vm2, 1.0, %v206_v34  ;;  %v163_v37 = vsel %vm161_vm3, %v147_v26, %v159_v35 }
 0x251   :  { %v164_v38 = vsel %vm162_vm4, %v149_v28, %v160_v36  ;;  %165 = vst [vmem:[#allocation8] sm:$0xff] %v163_v37 }
 0x252   :  { %166 = vst [vmem:[#allocation8 + $0x8] sm:$0xff] %v164_v38 }
 0x253   :  { %284 = shalt.err (!%p281_p0)
}
 0x254   :  { %s285_s30 = scalar_lea.hbm %s391_s4, 256 }
 0x255   :  { %p286_p1 = scmp.ne.s32.totalorder %s391_s4, %s285_s30  ;;  %p289_p2 = scmp.lt.u32.totalorder %s285_s30, %s391_s4 }
 0x257   :  { %p291_p3 = pnand %p289_p2, %p286_p1 }
 0x259   :  { %294 = shalt.err (!%p291_p3)
}
 0x25a   :  { %176 = dma.vmem_to_hbm [thread:$0]  %s174_s27, 256, %s391_s4, [#allocation4]  }
 0x25b   :  { %299 = dma.done.wait [#allocation4], 256  }
 0x25c   :  { %300 = vsyncadd [#allocation4], 4294967040 }
 0x25d   :  { %180 = vsyncpa [#allocation3], 1 }
 0x25e   :  { %181 = vsyncpa [#allocation6], 1 }
 0x25f   :  { %182 = vsyncpa [#allocation4], 1 }

</bundles_post_ra>
